<compile_context>
chip_gen: v7x
topology: tpu7x:2x2x1
jax: 0.10.0
libtpu: 0.0.40
codegen_flags: <defaults>
</compile_context>

<pallas_src>
import functools

import jax
import jax.numpy as jnp
from jax.experimental import pallas as pl
from jax.experimental.pallas import tpu as pltpu

EPS = 1e-6


def _round_up(x, m):
    return (x + m - 1) // m * m


def _vn_linear(w, xs):
    # w: [O, I]; xs: 3 x [I, TN]  ->  3 x [O, TN]   (channel mixing per vector comp.)
    return [jnp.dot(w, xv, preferred_element_type=jnp.float32) for xv in xs]


def _vn_leaky_relu(wd, xs, negative_slope, approx_recip):
    # Vector-Neuron LeakyReLU, algebraically identical to the mask/blend form:
    #   out = x - (1 - ns) * min(<x, d>, 0) / (|d|^2 + EPS) * d
    ds = _vn_linear(wd, xs)                                  # direction d = Wd @ x
    dot = xs[0] * ds[0] + xs[1] * ds[1] + xs[2] * ds[2]      # <x, d>    [C, TN]
    dsq = ds[0] * ds[0] + ds[1] * ds[1] + ds[2] * ds[2]      # |d|^2     [C, TN]
    coef = jnp.minimum(dot, 0.0) * pl.reciprocal(dsq + EPS, approx=approx_recip)
    if negative_slope != 0.0:
        coef = (1.0 - negative_slope) * coef
    return [xv - coef * dv for xv, dv in zip(xs, ds)]


def _vn_resnet_block_kernel(x_ref, wd0_ref, wfc0_ref, wd1_ref, wout_ref, o_ref, *,
                            negative_slope, has_shortcut, approx_recip):
    # x_ref : [Cin, 3, TN]   o_ref : [Cout, 3, TN]
    # (channels on sublanes after the per-component slice, points on lanes)
    xs = [x_ref[:, v, :].astype(jnp.float32) for v in range(3)]

    net = _vn_leaky_relu(wd0_ref[...], xs, negative_slope, approx_recip)   # actvn0
    net = _vn_linear(wfc0_ref[...], net)                                   # fc0
    net = _vn_leaky_relu(wd1_ref[...], net, negative_slope, approx_recip)  # actvn1

    if has_shortcut:
        # Fused fc1 + shortcut: wout = [wfc1 | wsc], operand = [net ; x]  (K doubled).
        wout = wout_ref[...]
        outs = [jnp.dot(wout, jnp.concatenate([nv, xv], axis=0),
                        preferred_element_type=jnp.float32)
                for nv, xv in zip(net, xs)]
    else:
        # Identity shortcut: out = x + fc1(net)
        dxs = _vn_linear(wout_ref[...], net)
        outs = [xv + dv for xv, dv in zip(xs, dxs)]

    for v in range(3):
        o_ref[:, v, :] = outs[v].astype(o_ref.dtype)


def vn_resnet_block(x, params, *, negative_slope=0.0, tile_n=2048,
                    approx_reciprocal=False):
    """Vector-Neuron ResNet block.

    x: [B, Cin, 3, N] (PyTorch layout; f32 or bf16 — math is f32 inside).
    params: wd0 [Cin,Cin], wfc0 [Ch,Cin], wd1 [Ch,Ch], wfc1 [Cout,Ch],
            wsc [Cout,Cin] or None (required to be None iff Cin == Cout).
    Returns [B, Cout, 3, N] in x.dtype.
    """
    wd0, wfc0, wd1, wfc1, wsc = (params["wd0"], params["wfc0"], params["wd1"],
                                 params["wfc1"], params["wsc"])
    B, Cin, V, N = x.shape
    assert V == 3
    Ch = wfc0.shape[0]
    Cout = wfc1.shape[0]
    has_shortcut = wsc is not None
    if not has_shortcut:
        assert Cin == Cout

    f32 = jnp.float32
    wd0, wfc0, wd1, wfc1 = (w.astype(f32) for w in (wd0, wfc0, wd1, wfc1))
    if has_shortcut:
        wout = jnp.concatenate([wfc1, wsc.astype(f32)], axis=1)   # [Cout, Ch+Cin]
    else:
        wout = wfc1                                               # [Cout, Ch]

    # ---- tiling over the point axis; pad N up to a multiple of tile_n -------
    tile_n = _round_up(min(int(tile_n), N), 128)
    n_pad = _round_up(N, tile_n)
    if n_pad != N:
        x = jnp.pad(x, ((0, 0), (0, 0), (0, 0), (0, n_pad - N)))

    # Free contiguous reshape only — no HBM transpose pass.
    x_k = x.reshape(B * Cin, 3, n_pad)

    grid = (B, n_pad // tile_n)
    kernel = functools.partial(_vn_resnet_block_kernel,
                               negative_slope=float(negative_slope),
                               has_shortcut=has_shortcut,
                               approx_recip=approx_reciprocal)

    def wspec(w):
        return pl.BlockSpec(w.shape, lambda b, n: (0, 0))

    out_k = pl.pallas_call(
        kernel,
        out_shape=jax.ShapeDtypeStruct((B * Cout, 3, n_pad), x.dtype),
        grid=grid,
        in_specs=[
            pl.BlockSpec((Cin, 3, tile_n), lambda b, n: (b, 0, n)),
            wspec(wd0), wspec(wfc0), wspec(wd1), wspec(wout),
        ],
        out_specs=pl.BlockSpec((Cout, 3, tile_n), lambda b, n: (b, 0, n)),
        compiler_params=pltpu.CompilerParams(
            dimension_semantics=("parallel", "parallel")),
    )(x_k, wd0, wfc0, wd1, wout)

    out = out_k.reshape(B, Cout, 3, n_pad)
    if n_pad != N:
        out = out[..., :N]
    return out


# ---------------------- pure-JAX reference (for validation) -----------------
def _vn_linear_ref(w, x):                       # x: [B, I, 3, N]
    return jnp.einsum("oi,bivn->bovn", w, x)


def _vn_leaky_relu_ref(wd, x, ns):
    d = jnp.einsum("ji,bivn->bjvn", wd, x)
    dot = jnp.sum(x * d, axis=2, keepdims=True)
    dsq = jnp.sum(d * d, axis=2, keepdims=True)
    mask = (dot >= 0.0).astype(x.dtype)
    return ns * x + (1.0 - ns) * (mask * x + (1.0 - mask) * (x - (dot / (dsq + EPS)) * d))


def vn_resnet_block_ref(x, params, *, negative_slope=0.0):
    net = _vn_leaky_relu_ref(params["wd0"], x, negative_slope)
    net = _vn_linear_ref(params["wfc0"], net)
    net = _vn_leaky_relu_ref(params["wd1"], net, negative_slope)
    dx = _vn_linear_ref(params["wfc1"], net)
    x_s = _vn_linear_ref(params["wsc"], x) if params["wsc"] is not None else x
    return x_s + dx


# ----------------------------------- main ------------------------------------
if __name__ == "__main__":
    def make_params(key, size_in, size_out, size_h):
        k0, k1, k2, k3, k4 = jax.random.split(key, 5)
        # NOTE: the original module zero-inits fc1.map_to_feat; small random
        # weights are used here so the full compute path is exercised.
        return {
            "wd0":  0.2 * jax.random.normal(k0, (size_in, size_in), jnp.float32),   # actvn0.map_to_dir
            "wfc0": 0.2 * jax.random.normal(k1, (size_h, size_in), jnp.float32),    # fc0.map_to_feat
            "wd1":  0.2 * jax.random.normal(k2, (size_h, size_h), jnp.float32),     # actvn1.map_to_dir
            "wfc1": 0.2 * jax.random.normal(k3, (size_out, size_h), jnp.float32),   # fc1.map_to_feat
            "wsc":  (0.2 * jax.random.normal(k4, (size_out, size_in), jnp.float32)
                     if size_in != size_out else None),                              # shortcut iff Cin != Cout
        }

    key = jax.random.PRNGKey(0)
    k_xa, k_xb, k_pa, k_pb = jax.random.split(key, 4)

    # Config A: size_in != size_out -> learned shortcut, fused into the fc1 matmul.
    B, N = 2, 256
    size_in, size_out = 8, 16
    size_h = min(size_in, size_out)
    x_a = jax.random.normal(k_xa, (B, size_in, 3, N), jnp.float32)
    p_a = make_params(k_pa, size_in, size_out, size_h)
    out_a = jax.block_until_ready(vn_resnet_block(x_a, p_a, negative_slope=0.0))
    ref_a = vn_resnet_block_ref(x_a, p_a, negative_slope=0.0)
    assert out_a.shape == (B, size_out, 3, N)
    assert jnp.allclose(out_a, ref_a, atol=1e-4, rtol=1e-4), \
        f"config A max err {float(jnp.max(jnp.abs(out_a - ref_a)))}"

    # Config B: size_in == size_out -> identity shortcut (no wsc operand at all),
    # ragged N (not a multiple of 128) exercises the padded-tail path, ns != 0.
    size_in = size_out = size_h = 16
    N_b = 200
    x_b = jax.random.normal(k_xb, (B, size_in, 3, N_b), jnp.float32)
    p_b = make_params(k_pb, size_in, size_out, size_h)
    out_b = jax.block_until_ready(vn_resnet_block(x_b, p_b, negative_slope=0.2))
    ref_b = vn_resnet_block_ref(x_b, p_b, negative_slope=0.2)
    assert out_b.shape == (B, size_out, 3, N_b)
    assert jnp.allclose(out_b, ref_b, atol=1e-4, rtol=1e-4), \
        f"config B max err {float(jnp.max(jnp.abs(out_b - ref_b)))}"

    print("KERNEL_OK")
</pallas_src>

<mosaic_0001>
module attributes {stable_mosaic.version = 11 : i64} {
  func.func @_vn_resnet_block_kernel(%arg0: i32, %arg1: i32, %arg2: memref<8x3x256xf32, #tpu.memory_space<vmem>>, %arg3: memref<8x8xf32, #tpu.memory_space<vmem>>, %arg4: memref<8x8xf32, #tpu.memory_space<vmem>>, %arg5: memref<8x8xf32, #tpu.memory_space<vmem>>, %arg6: memref<16x16xf32, #tpu.memory_space<vmem>>, %arg7: memref<16x3x256xf32, #tpu.memory_space<vmem>>) attributes {dimension_semantics = [#tpu.dimension_semantics<parallel>, #tpu.dimension_semantics<parallel>], iteration_bounds = array<i64: 2, 1>, scalar_prefetch = 0 : i64, scratch_operands = 0 : i64, tpu.core_type = #tpu.core_type<tc>, window_params = [{transform_indices = @transform_0, window_bounds = array<i64: 8, 3, 256>}, {pipeline_mode = #tpu.pipeline_mode<synchronous>, transform_indices = @transform_1, window_bounds = array<i64: 8, 8>}, {pipeline_mode = #tpu.pipeline_mode<synchronous>, transform_indices = @transform_2, window_bounds = array<i64: 8, 8>}, {pipeline_mode = #tpu.pipeline_mode<synchronous>, transform_indices = @transform_3, window_bounds = array<i64: 8, 8>}, {pipeline_mode = #tpu.pipeline_mode<synchronous>, transform_indices = @transform_4, window_bounds = array<i64: 16, 16>}, {transform_indices = @transform_5, window_bounds = array<i64: 16, 3, 256>}]} {
    %c0 = arith.constant 0 : index
    %c0_0 = arith.constant 0 : index
    %c0_1 = arith.constant 0 : index
    %0 = vector.load %arg2[%c0, %c0_0, %c0_1] : memref<8x3x256xf32, #tpu.memory_space<vmem>>, vector<8x1x256xf32>
    %1 = vector.shape_cast %0 : vector<8x1x256xf32> to vector<8x256xf32>
    %c0_2 = arith.constant 0 : index
    %c1 = arith.constant 1 : index
    %c0_3 = arith.constant 0 : index
    %2 = vector.load %arg2[%c0_2, %c1, %c0_3] : memref<8x3x256xf32, #tpu.memory_space<vmem>>, vector<8x1x256xf32>
    %3 = vector.shape_cast %2 : vector<8x1x256xf32> to vector<8x256xf32>
    %c0_4 = arith.constant 0 : index
    %c2 = arith.constant 2 : index
    %c0_5 = arith.constant 0 : index
    %4 = vector.load %arg2[%c0_4, %c2, %c0_5] : memref<8x3x256xf32, #tpu.memory_space<vmem>>, vector<8x1x256xf32>
    %5 = vector.shape_cast %4 : vector<8x1x256xf32> to vector<8x256xf32>
    %c0_6 = arith.constant 0 : index
    %c0_7 = arith.constant 0 : index
    %6 = vector.load %arg3[%c0_6, %c0_7] : memref<8x8xf32, #tpu.memory_space<vmem>>, vector<8x8xf32>
    %cst = arith.constant dense<0.000000e+00> : vector<8x256xf32>
    %7 = tpu.matmul %6, %1, %cst {dimension_numbers = #tpu.dot_dimension_numbers<[1], [0], [0], [1], [0, 0, 1, 1], [], []>} : vector<8x8xf32>, vector<8x256xf32>, vector<8x256xf32> -> vector<8x256xf32>
    %cst_8 = arith.constant dense<0.000000e+00> : vector<8x256xf32>
    %8 = tpu.matmul %6, %3, %cst_8 {dimension_numbers = #tpu.dot_dimension_numbers<[1], [0], [0], [1], [0, 0, 1, 1], [], []>} : vector<8x8xf32>, vector<8x256xf32>, vector<8x256xf32> -> vector<8x256xf32>
    %cst_9 = arith.constant dense<0.000000e+00> : vector<8x256xf32>
    %9 = tpu.matmul %6, %5, %cst_9 {dimension_numbers = #tpu.dot_dimension_numbers<[1], [0], [0], [1], [0, 0, 1, 1], [], []>} : vector<8x8xf32>, vector<8x256xf32>, vector<8x256xf32> -> vector<8x256xf32>
    %10 = arith.mulf %1, %7 : vector<8x256xf32>
    %11 = arith.mulf %3, %8 : vector<8x256xf32>
    %12 = arith.addf %10, %11 : vector<8x256xf32>
    %13 = arith.mulf %5, %9 : vector<8x256xf32>
    %14 = arith.addf %12, %13 : vector<8x256xf32>
    %15 = arith.mulf %7, %7 : vector<8x256xf32>
    %16 = arith.mulf %8, %8 : vector<8x256xf32>
    %17 = arith.addf %15, %16 : vector<8x256xf32>
    %18 = arith.mulf %9, %9 : vector<8x256xf32>
    %19 = arith.addf %17, %18 : vector<8x256xf32>
    %cst_10 = arith.constant 0.000000e+00 : f32
    %20 = vector.broadcast %cst_10 : f32 to vector<8x256xf32>
    %21 = arith.minimumf %14, %20 : vector<8x256xf32>
    %cst_11 = arith.constant 9.99999997E-7 : f32
    %22 = vector.broadcast %cst_11 : f32 to vector<8x256xf32>
    %23 = arith.addf %19, %22 : vector<8x256xf32>
    %24 = tpu.reciprocal %23 : vector<8x256xf32> -> vector<8x256xf32>
    %25 = arith.mulf %21, %24 : vector<8x256xf32>
    %26 = arith.mulf %25, %7 : vector<8x256xf32>
    %27 = arith.subf %1, %26 : vector<8x256xf32>
    %28 = arith.mulf %25, %8 : vector<8x256xf32>
    %29 = arith.subf %3, %28 : vector<8x256xf32>
    %30 = arith.mulf %25, %9 : vector<8x256xf32>
    %31 = arith.subf %5, %30 : vector<8x256xf32>
    %c0_12 = arith.constant 0 : index
    %c0_13 = arith.constant 0 : index
    %32 = vector.load %arg4[%c0_12, %c0_13] : memref<8x8xf32, #tpu.memory_space<vmem>>, vector<8x8xf32>
    %cst_14 = arith.constant dense<0.000000e+00> : vector<8x256xf32>
    %33 = tpu.matmul %32, %27, %cst_14 {dimension_numbers = #tpu.dot_dimension_numbers<[1], [0], [0], [1], [0, 0, 1, 1], [], []>} : vector<8x8xf32>, vector<8x256xf32>, vector<8x256xf32> -> vector<8x256xf32>
    %cst_15 = arith.constant dense<0.000000e+00> : vector<8x256xf32>
    %34 = tpu.matmul %32, %29, %cst_15 {dimension_numbers = #tpu.dot_dimension_numbers<[1], [0], [0], [1], [0, 0, 1, 1], [], []>} : vector<8x8xf32>, vector<8x256xf32>, vector<8x256xf32> -> vector<8x256xf32>
    %cst_16 = arith.constant dense<0.000000e+00> : vector<8x256xf32>
    %35 = tpu.matmul %32, %31, %cst_16 {dimension_numbers = #tpu.dot_dimension_numbers<[1], [0], [0], [1], [0, 0, 1, 1], [], []>} : vector<8x8xf32>, vector<8x256xf32>, vector<8x256xf32> -> vector<8x256xf32>
    %c0_17 = arith.constant 0 : index
    %c0_18 = arith.constant 0 : index
    %36 = vector.load %arg5[%c0_17, %c0_18] : memref<8x8xf32, #tpu.memory_space<vmem>>, vector<8x8xf32>
    %cst_19 = arith.constant dense<0.000000e+00> : vector<8x256xf32>
    %37 = tpu.matmul %36, %33, %cst_19 {dimension_numbers = #tpu.dot_dimension_numbers<[1], [0], [0], [1], [0, 0, 1, 1], [], []>} : vector<8x8xf32>, vector<8x256xf32>, vector<8x256xf32> -> vector<8x256xf32>
    %cst_20 = arith.constant dense<0.000000e+00> : vector<8x256xf32>
    %38 = tpu.matmul %36, %34, %cst_20 {dimension_numbers = #tpu.dot_dimension_numbers<[1], [0], [0], [1], [0, 0, 1, 1], [], []>} : vector<8x8xf32>, vector<8x256xf32>, vector<8x256xf32> -> vector<8x256xf32>
    %cst_21 = arith.constant dense<0.000000e+00> : vector<8x256xf32>
    %39 = tpu.matmul %36, %35, %cst_21 {dimension_numbers = #tpu.dot_dimension_numbers<[1], [0], [0], [1], [0, 0, 1, 1], [], []>} : vector<8x8xf32>, vector<8x256xf32>, vector<8x256xf32> -> vector<8x256xf32>
    %40 = arith.mulf %33, %37 : vector<8x256xf32>
    %41 = arith.mulf %34, %38 : vector<8x256xf32>
    %42 = arith.addf %40, %41 : vector<8x256xf32>
    %43 = arith.mulf %35, %39 : vector<8x256xf32>
    %44 = arith.addf %42, %43 : vector<8x256xf32>
    %45 = arith.mulf %37, %37 : vector<8x256xf32>
    %46 = arith.mulf %38, %38 : vector<8x256xf32>
    %47 = arith.addf %45, %46 : vector<8x256xf32>
    %48 = arith.mulf %39, %39 : vector<8x256xf32>
    %49 = arith.addf %47, %48 : vector<8x256xf32>
    %cst_22 = arith.constant 0.000000e+00 : f32
    %50 = vector.broadcast %cst_22 : f32 to vector<8x256xf32>
    %51 = arith.minimumf %44, %50 : vector<8x256xf32>
    %cst_23 = arith.constant 9.99999997E-7 : f32
    %52 = vector.broadcast %cst_23 : f32 to vector<8x256xf32>
    %53 = arith.addf %49, %52 : vector<8x256xf32>
    %54 = tpu.reciprocal %53 : vector<8x256xf32> -> vector<8x256xf32>
    %55 = arith.mulf %51, %54 : vector<8x256xf32>
    %56 = arith.mulf %55, %37 : vector<8x256xf32>
    %57 = arith.subf %33, %56 : vector<8x256xf32>
    %58 = arith.mulf %55, %38 : vector<8x256xf32>
    %59 = arith.subf %34, %58 : vector<8x256xf32>
    %60 = arith.mulf %55, %39 : vector<8x256xf32>
    %61 = arith.subf %35, %60 : vector<8x256xf32>
    %c0_24 = arith.constant 0 : index
    %c0_25 = arith.constant 0 : index
    %62 = vector.load %arg6[%c0_24, %c0_25] : memref<16x16xf32, #tpu.memory_space<vmem>>, vector<16x16xf32>
    %63 = tpu.concatenate %57, %1 in 0 : vector<8x256xf32>, vector<8x256xf32> -> vector<16x256xf32>
    %cst_26 = arith.constant dense<0.000000e+00> : vector<16x256xf32>
    %64 = tpu.matmul %62, %63, %cst_26 {dimension_numbers = #tpu.dot_dimension_numbers<[1], [0], [0], [1], [0, 0, 1, 1], [], []>} : vector<16x16xf32>, vector<16x256xf32>, vector<16x256xf32> -> vector<16x256xf32>
    %65 = tpu.concatenate %59, %3 in 0 : vector<8x256xf32>, vector<8x256xf32> -> vector<16x256xf32>
    %cst_27 = arith.constant dense<0.000000e+00> : vector<16x256xf32>
    %66 = tpu.matmul %62, %65, %cst_27 {dimension_numbers = #tpu.dot_dimension_numbers<[1], [0], [0], [1], [0, 0, 1, 1], [], []>} : vector<16x16xf32>, vector<16x256xf32>, vector<16x256xf32> -> vector<16x256xf32>
    %67 = tpu.concatenate %61, %5 in 0 : vector<8x256xf32>, vector<8x256xf32> -> vector<16x256xf32>
    %cst_28 = arith.constant dense<0.000000e+00> : vector<16x256xf32>
    %68 = tpu.matmul %62, %67, %cst_28 {dimension_numbers = #tpu.dot_dimension_numbers<[1], [0], [0], [1], [0, 0, 1, 1], [], []>} : vector<16x16xf32>, vector<16x256xf32>, vector<16x256xf32> -> vector<16x256xf32>
    %c0_29 = arith.constant 0 : index
    %c0_30 = arith.constant 0 : index
    %c0_31 = arith.constant 0 : index
    %69 = vector.load %arg7[%c0_29, %c0_30, %c0_31] : memref<16x3x256xf32, #tpu.memory_space<vmem>>, vector<16x1x256xf32>
    %70 = vector.shape_cast %69 : vector<16x1x256xf32> to vector<16x256xf32>
    %71 = vector.shape_cast %64 : vector<16x256xf32> to vector<16x1x256xf32>
    tpu.vector_store %arg7[%c0_29, %c0_30, %c0_31], %71 {strides = array<i32>} : memref<16x3x256xf32, #tpu.memory_space<vmem>>, vector<16x1x256xf32>,
    %c0_32 = arith.constant 0 : index
    %c1_33 = arith.constant 1 : index
    %c0_34 = arith.constant 0 : index
    %72 = vector.load %arg7[%c0_32, %c1_33, %c0_34] : memref<16x3x256xf32, #tpu.memory_space<vmem>>, vector<16x1x256xf32>
    %73 = vector.shape_cast %72 : vector<16x1x256xf32> to vector<16x256xf32>
    %74 = vector.shape_cast %66 : vector<16x256xf32> to vector<16x1x256xf32>
    tpu.vector_store %arg7[%c0_32, %c1_33, %c0_34], %74 {strides = array<i32>} : memref<16x3x256xf32, #tpu.memory_space<vmem>>, vector<16x1x256xf32>,
    %c0_35 = arith.constant 0 : index
    %c2_36 = arith.constant 2 : index
    %c0_37 = arith.constant 0 : index
    %75 = vector.load %arg7[%c0_35, %c2_36, %c0_37] : memref<16x3x256xf32, #tpu.memory_space<vmem>>, vector<16x1x256xf32>
    %76 = vector.shape_cast %75 : vector<16x1x256xf32> to vector<16x256xf32>
    %77 = vector.shape_cast %68 : vector<16x256xf32> to vector<16x1x256xf32>
    tpu.vector_store %arg7[%c0_35, %c2_36, %c0_37], %77 {strides = array<i32>} : memref<16x3x256xf32, #tpu.memory_space<vmem>>, vector<16x1x256xf32>,
    return
  }
  func.func @transform_0(%arg0: i32, %arg1: i32) -> (i32, i32, i32) {
    %c0_i32 = arith.constant 0 : i32
    %c0_i32_0 = arith.constant 0 : i32
    return %arg0, %c0_i32, %arg1 : i32, i32, i32
  }
  func.func @transform_1(%arg0: i32, %arg1: i32) -> (i32, i32) {
    %c0_i32 = arith.constant 0 : i32
    %c0_i32_0 = arith.constant 0 : i32
    %c0_i32_1 = arith.constant 0 : i32
    return %c0_i32, %c0_i32_0 : i32, i32
  }
  func.func @transform_2(%arg0: i32, %arg1: i32) -> (i32, i32) {
    %c0_i32 = arith.constant 0 : i32
    %c0_i32_0 = arith.constant 0 : i32
    %c0_i32_1 = arith.constant 0 : i32
    return %c0_i32, %c0_i32_0 : i32, i32
  }
  func.func @transform_3(%arg0: i32, %arg1: i32) -> (i32, i32) {
    %c0_i32 = arith.constant 0 : i32
    %c0_i32_0 = arith.constant 0 : i32
    %c0_i32_1 = arith.constant 0 : i32
    return %c0_i32, %c0_i32_0 : i32, i32
  }
  func.func @transform_4(%arg0: i32, %arg1: i32) -> (i32, i32) {
    %c0_i32 = arith.constant 0 : i32
    %c0_i32_0 = arith.constant 0 : i32
    %c0_i32_1 = arith.constant 0 : i32
    return %c0_i32, %c0_i32_0 : i32, i32
  }
  func.func @transform_5(%arg0: i32, %arg1: i32) -> (i32, i32, i32) {
    %c0_i32 = arith.constant 0 : i32
    %c0_i32_0 = arith.constant 0 : i32
    return %arg0, %c0_i32, %arg1 : i32, i32, i32
  }
}

</mosaic_0001>

<bundles_post_ra>
// kernel: tpu_custom_call.1
= control target key start
LH: loop header
LB: loop body
LE: loop exit
PB: predicated region body
PF: predicated region fallthrough
CT: control target
= control target key end

     0   :  { %s2816_s18 = smov 0   ;;  %s2818_s19 = smov 0   ;;  %s3458_s0 = inlined_call_operand.vmem [shape: f32[16,3,256], index: 0, kind: input, shape index: {}]   ;;  %s3459_s1 = inlined_call_operand.vmem [shape: f32[8,8], index: 1, kind: input, shape index: {}]   ;;  %s3460_s2 = inlined_call_operand.vmem [shape: f32[8,8], index: 2, kind: input, shape index: {}]   ;;  %s3461_s3 = inlined_call_operand.vmem [shape: f32[8,8], index: 3, kind: input, shape index: {}]   ;;  %s3462_s4 = inlined_call_operand.vmem [shape: f32[16,16], index: 4, kind: input, shape index: {}]   ;;  %s3463_s5 = inlined_call_operand.vmem [shape: f32[32,3,256], index: 5, kind: output, shape index: {}]  }
   0x1   :  { %s2820_s20 = smov 0  }
   0x2 LB: > { %s27_s21 = sadd.s32 1, %s2778_s19  ;;  %p2618_p0 = scmp.ge.s32.totalorder %s2782_s20, 1  ;;  %s2782_s20 = sphi %s2820_s20, %s15_s20   ;;  %s2778_s19 = sphi %s2818_s19, %s3535_s19   ;;  %s2774_s18 = sphi %s2816_s18, %s3534_s18  }
   0x3   : > { %p29_p1 = scmp.ge.s32.totalorder %s27_s21, 2  ;;  %p210_p2 = scmp.lt.s32.totalorder %s2782_s20, 3 }
   0x5   : > { %s3537_s21 = smov (%p29_p1, %s27_s21), 0  ;;  %p211_p3 = pnand %p2618_p0, %p210_p2 }
   0x7   : > { %214 = sbr.rel (%p211_p3) target bundleno = 1033 (0x409), region = 40 }
   0xe   : > { %s2619_s22 = sshll.u32 %s2774_s18, 3  ;;  %v3464_v0 = vlaneseq  ;;  %v2784_v1 = vmov 1966171168   ;;  %v3465_v3 = vmov 0.0   ;;  %vm396_vm0 = vcmask 64512   ;;  %s2622_s12 = sshll.u32 %s2774_s18, 4 }
   0xf   : > { %p250_p4 = scmp.lt.s32.totalorder %s2619_s22, 15  ;;  %v333_v2 = vunpack.c.l.s4 %v2784_v1  ;;  %464 = vmatprep.mubr.f32.mxu0 %v3465_v3  ;;  %611 = vmatprep.mubr.f32.mxu1 %v3465_v3  ;;  %vm1827_vm1 = vcmask 130048   ;;  %p262_p5 = scmp.lt.s32.totalorder %s2622_s12, 31 }
  0x10   : > { %v336_v4 = vshrl.u32 %v3464_v0, 7 }
  0x11   : > { %s3539_s22 = smov (!%p250_p4, %s2619_s22), 15  ;;  %v334_v5 = vunpack.c.0.s8 %v333_v2  ;;  %s3541_s12 = smov (!%p262_p5, %s2622_s12), 31 }
  0x12   : > { %s2712_s23 = sshll.u32 %s3539_s22, 3  ;;  %s2713_s13 = sshll.u32 %s3541_s12, 3 }
  0x13   : > { %s2843_s26 = scalar_lea.vmem %s3458_s0, %s2712_s23  ;;  %v2845_v6 = vsub.s32 %v334_v5, %v336_v4  ;;  %v319_v5 = vld [vmem:[%s3459_s1] sm:$0xff]  ;;  %s3260_s16 = scalar_lea.vmem %s3463_s5, %s2713_s13 }
  0x14   : > { %v2848_v7 = vld [vmem:[%s2843_s26] ss:$4 sm:$0x3]  ;;  %v2851_v8 = vld [vmem:[%s2843_s26 + $0x8] ss:$4 sm:$0x3] }
  0x15   : > { %v2854_v9 = vld [vmem:[%s2843_s26 + $0x10] ss:$4 sm:$0x3]  ;;  %v2857_v10 = vld [vmem:[%s2843_s26 + $0x18] ss:$4 sm:$0x3]  ;;  %v328_v11 = vcombine.low %v2848_v7, %v2851_v8 }
  0x16   : > { %v2862_v12 = vld [vmem:[%s2843_s26 + $0x20] ss:$4 sm:$0x3]  ;;  %v2865_v13 = vld [vmem:[%s2843_s26 + $0x28] ss:$4 sm:$0x3]  ;;  %v329_v14 = vcombine.low %v2854_v9, %v2857_v10 }
  0x17   : > { %v2870_v15 = vld [vmem:[%s2843_s26 + $0x30] ss:$4 sm:$0x3]  ;;  %v2873_v16 = vld [vmem:[%s2843_s26 + $0x38] ss:$4 sm:$0x3]  ;;  %v330_v17 = vcombine.low %v2862_v12, %v2865_v13  ;;  %v338_v18 = vrot.slane %v328_v11, %v2845_v6 }
  0x18   : > { %3488 = vst [vmem:[#allocation2_spill] sm:$0xff] %v2873_v16  ;;  %v331_v19 = vcombine.low %v2870_v15, %v2873_v16  ;;  %v345_v20 = vrot.slane %v329_v14, %v2845_v6  ;;  %v2882_v21 = vld [vmem:[%s2843_s26 + $0x1] ss:$4 sm:$0x3] }
  0x19   : > { %3489 = vst [vmem:[#allocation3_spill] sm:$0xff] %v2882_v21  ;;  %v2885_v22 = vld [vmem:[%s2843_s26 + $0x9] ss:$4 sm:$0x3]  ;;  %v352_v23 = vrot.slane %v330_v17, %v2845_v6 }
  0x1a   : > { %3490 = vst [vmem:[#allocation4_spill] sm:$0xff] %v2885_v22  ;;  %v2889_v24 = vld [vmem:[%s2843_s26 + $0x11] ss:$4 sm:$0x3]  ;;  %v479_v26 = vcombine.low %v2882_v21, %v2885_v22  ;;  %v359_v27 = vrot.slane %v331_v19, %v2845_v6  ;;  %v361_v28 = vcombine.high %v338_v18, %v345_v20  ;;  %v360_v32 = vcombine.low %v338_v18, %v345_v20 }
  0x1b   : > { %3491 = vst [vmem:[#allocation5_spill] sm:$0xff] %v2889_v24  ;;  %v2892_v25 = vld [vmem:[%s2843_s26 + $0x19] ss:$4 sm:$0x3] }
  0x1c   : > { %v2898_v29 = vld [vmem:[%s2843_s26 + $0x21] ss:$4 sm:$0x3]  ;;  %v2901_v30 = vld [vmem:[%s2843_s26 + $0x29] ss:$4 sm:$0x3]  ;;  %v480_v31 = vcombine.low %v2889_v24, %v2892_v25  ;;  %v489_v36 = vrot.slane %v479_v26, %v2845_v6  ;;  %v363_v37 = vcombine.high %v352_v23, %v359_v27  ;;  %v377_v38 = vrot.slane %v361_v28, %v2845_v6 }
  0x1d   : > { %3492 = vst [vmem:[#allocation6_spill] sm:$0xff] %v2898_v29  ;;  %3493 = vst [vmem:[#allocation7_spill] sm:$0xff] %v2901_v30  ;;  %v2906_v33 = vld [vmem:[%s2843_s26 + $0x31] ss:$4 sm:$0x3]  ;;  %v481_v35 = vcombine.low %v2898_v29, %v2901_v30  ;;  %v362_v44 = vcombine.low %v352_v23, %v359_v27  ;;  %v370_v45 = vrot.slane %v360_v32, %v2845_v6 }
  0x1e   : > { %3494 = vst [vmem:[#allocation8_spill] sm:$0xff] %v2906_v33  ;;  %v2909_v34 = vld [vmem:[%s2843_s26 + $0x39] ss:$4 sm:$0x3]  ;;  %v496_v40 = vrot.slane %v480_v31, %v2845_v6  ;;  %v391_v49 = vrot.slane %v363_v37, %v2845_v6 }
  0x1f   : > { %v482_v39 = vcombine.low %v2906_v33, %v2909_v34  ;;  %v2919_v41 = vld [vmem:[%s2843_s26 + $0x2] ss:$4 sm:$0x3]  ;;  %v2922_v42 = vld [vmem:[%s2843_s26 + $0xa] ss:$4 sm:$0x3]  ;;  %v503_v43 = vrot.slane %v481_v35, %v2845_v6  ;;  %v384_v55 = vrot.slane %v362_v44, %v2845_v6 }
  0x20   : > { %v2927_v46 = vld [vmem:[%s2843_s26 + $0x12] ss:$4 sm:$0x3]  ;;  %v2930_v47 = vld [vmem:[%s2843_s26 + $0x1a] ss:$4 sm:$0x3]  ;;  %v626_v48 = vcombine.low %v2919_v41, %v2922_v42  ;;  %v512_v51 = vcombine.high %v489_v36, %v496_v40  ;;  %v511_v52 = vcombine.low %v489_v36, %v496_v40  ;;  %v2954_v61 = vcombine.low %v377_v38, %v391_v49 }
  0x21   : > { %v510_v50 = vrot.slane %v482_v39, %v2845_v6  ;;  %v2937_v53 = vld [vmem:[%s2843_s26 + $0x22] ss:$4 sm:$0x3]  ;;  %v2940_v54 = vld [vmem:[%s2843_s26 + $0x2a] ss:$4 sm:$0x3]  ;;  %v627_v58 = vcombine.low %v2927_v46, %v2930_v47  ;;  %v2957_v2 = vcombine.low %v370_v45, %v384_v55 }
  0x22   : > { %3495 = vst [vmem:[#allocation9_spill] sm:$0xff] %v2940_v54  ;;  %v2944_v56 = vld [vmem:[%s2843_s26 + $0x32] ss:$4 sm:$0x3]  ;;  %v628_v59 = vcombine.low %v2937_v53, %v2940_v54  ;;  %v636_v60 = vrot.slane %v626_v48, %v2845_v6  ;;  %3498 = vst [vmem:[#allocation12_spill] sm:$0xff] %v2954_v61  ;;  %v528_v63 = vrot.slane %v512_v51, %v2845_v6  ;;  %400 = vmatprep.subr.mxu0 %v2954_v61 }
  0x23   : > { %3496 = vst [vmem:[#allocation10_spill] sm:$0xff] %v2944_v56  ;;  %v2947_v57 = vld [vmem:[%s2843_s26 + $0x3a] ss:$4 sm:$0x3]  ;;  %v514_v62 = vcombine.high %v503_v43, %v510_v50  ;;  %v513_v1 = vcombine.low %v503_v43, %v510_v50  ;;  %3499 = vst [vmem:[#allocation13_spill] sm:$0xff] %v2957_v2  ;;  %v521_v4 = vrot.slane %v511_v52, %v2845_v6  ;;  %401 = vmatpush1.msra.mxu0 %v2957_v2 }
  0x24   : > { %3497 = vst [vmem:[#allocation11_spill] sm:$0xff] %v2947_v57  ;;  %v629_v11 = vcombine.low %v2944_v56, %v2947_v57  ;;  %v643_v14 = vrot.slane %v627_v58, %v2845_v6  ;;  %v650_v19 = vrot.slane %v628_v59, %v2845_v6  ;;  %2648 = vmatmul.mubr.msk.f32.vlgmr.msra.gmra.mrb[0].mxu0 %vm396_vm0, %v319_v5 }
  0x25   : > { %v542_v17 = vrot.slane %v514_v62, %v2845_v6  ;;  %v535_v18 = vrot.slane %v513_v1, %v2845_v6  ;;  %758 = vmatprep.mubr.f32.mxu0 %v3465_v3 }
  0x26   : > { %v657_v20 = vrot.slane %v629_v11, %v2845_v6  ;;  %v659_v23 = vcombine.high %v636_v60, %v643_v14  ;;  %v658_v26 = vcombine.low %v636_v60, %v643_v14 }
  0x27   : > { %v2972_v27 = vcombine.low %v528_v63, %v542_v17  ;;  %v2974_v28 = vcombine.low %v521_v4, %v535_v18 }
  0x28   : > { %v661_v31 = vcombine.high %v650_v19, %v657_v20  ;;  %v675_v32 = vrot.slane %v659_v23, %v2845_v6  ;;  %v660_v35 = vcombine.low %v650_v19, %v657_v20  ;;  %v668_v36 = vrot.slane %v658_v26, %v2845_v6 }
  0x29   : > { %3500 = vst [vmem:[#allocation14_spill] sm:$0xff] %v2972_v27  ;;  %3501 = vst [vmem:[#allocation15_spill] sm:$0xff] %v2974_v28  ;;  %547 = vmatprep.subr.mxu1 %v2972_v27 }
  0x2a   : > { %548 = vmatpush1.msra.mxu1 %v2974_v28  ;;  %v689_v37 = vrot.slane %v661_v31, %v2845_v6  ;;  %v682_v38 = vrot.slane %v660_v35, %v2845_v6 }
  0x2b   : > { %2649 = vmatmul.mubr.msk.f32.vlgmr.msra.gmra.mrb[0].mxu1 %vm396_vm0, %v319_v5 }
  0x2c   : > { %v2985_v39 = vcombine.low %v675_v32, %v689_v37  ;;  %v2987_v40 = vcombine.low %v668_v36, %v682_v38  ;;  %1267 = vmatprep.mubr.f32.mxu1 %v3465_v3 }
  0x2e   : > { %3502 = vst [vmem:[#allocation16_spill] sm:$0xff] %v2985_v39  ;;  %3503 = vst [vmem:[#allocation17_spill] sm:$0xff] %v2987_v40  ;;  %694 = vmatprep.subr.mxu0 %v2985_v39 }
  0x2f   : > { %695 = vmatpush1.msra.mxu0 %v2987_v40 }
  0x30   : > { %2650 = vmatmul.mubr.msk.f32.vlgmr.msra.gmra.mrb[2].mxu0 %vm396_vm0, %v319_v5 }
  0x31   : > { %1414 = vmatprep.mubr.f32.mxu0 %v3465_v3 }
  0xf7   : > { %v466_v43 = vpop.f32.mrb[0].mxu0 }
  0xf8   : > { %v468_v44 = vpop.f32.mrb[1].mxu0  ;;  %v985_v49 = vmul.f32 %v466_v43, %v466_v43 }
  0xf9   : > { %v767_v45 = vcombine.low %v466_v43, %v468_v44  ;;  %v768_v48 = vcombine.high %v466_v43, %v468_v44  ;;  %v986_v58 = vmul.f32 %v468_v44, %v468_v44 }
  0xfb   : > { %v775_v51 = vrot.slane %v767_v45, %v2845_v6  ;;  %v782_v52 = vrot.slane %v768_v48, %v2845_v6 }
  0xfd   : > { %v783_v60 = vcombine.high %v775_v51, %v775_v51  ;;  %v784_v62 = vcombine.high %v782_v52, %v782_v52  ;;  %v2997_v63 = vrot.slane %v775_v51, %v2845_v6  ;;  %v3000_v1 = vrot.slane %v782_v52, %v2845_v6 }
  0xfe   : > { %v613_v50 = vpop.f32.mrb[0].mxu1 }
  0xff   : > { %v987_v55 = vmul.f32 %v613_v50, %v613_v50  ;;  %v615_v59 = vpop.f32.mrb[1].mxu1  ;;  %v3003_v17 = vrot.slane %v783_v60, %v2845_v6  ;;  %v3006_v18 = vrot.slane %v784_v62, %v2845_v6  ;;  %v3010_v19 = vcombine.high %v2997_v63, %v2997_v63 }
 0x100   : > { %v835_v5 = vcombine.low %v613_v50, %v615_v59  ;;  %v836_v11 = vcombine.high %v613_v50, %v615_v59  ;;  %v988_v14 = vmul.f32 %v615_v59, %v615_v59  ;;  %v3014_v20 = vcombine.high %v3000_v1, %v3000_v1 }
 0x101   : > { %v989_v4 = vadd.f32 %v987_v55, %v985_v49  ;;  %v825_v23 = vmul.f32 %v2997_v63, %v2848_v7  ;;  %v829_v26 = vmul.f32 %v2862_v12, %v3000_v1  ;;  %v3024_v36 = vcombine.high %v3003_v17, %v3003_v17 }
 0x102   : > { %v843_v31 = vrot.slane %v835_v5, %v2845_v6  ;;  %v850_v32 = vrot.slane %v836_v11, %v2845_v6  ;;  %v3028_v37 = vcombine.high %v3006_v18, %v3006_v18  ;;  %v826_v38 = vmul.f32 %v2851_v8, %v3003_v17 }
 0x103   : > { %v760_v35 = vpop.f32.mrb[2].mxu0  ;;  %v827_v43 = vmul.f32 %v2854_v9, %v3010_v19  ;;  %v830_v45 = vmul.f32 %v2865_v13, %v3006_v18  ;;  %v831_v48 = vmul.f32 %v2870_v15, %v3014_v20  ;;  %v828_v51 = vmul.f32 %v2857_v10, %v3024_v36 }
 0x104   : > { %v762_v44 = vpop.f32.mrb[3].mxu0  ;;  %v851_v49 = vcombine.high %v843_v31, %v843_v31  ;;  %v852_v50 = vcombine.high %v850_v32, %v850_v32  ;;  %v832_v52 = vmul.f32 %v2873_v16, %v3028_v37  ;;  %v3043_v55 = vrot.slane %v843_v31, %v2845_v6 }
 0x105   : > { %v3046_v59 = vrot.slane %v850_v32, %v2845_v6  ;;  %v990_v5 = vadd.f32 %v988_v14, %v986_v58  ;;  %v991_v11 = vmul.f32 %v760_v35, %v760_v35 }
 0x106   : > { %3504 = vst [vmem:[#allocation18_spill] sm:$0xff] %v3043_v55  ;;  %v3049_v60 = vrot.slane %v851_v49, %v2845_v6  ;;  %v3052_v62 = vrot.slane %v852_v50, %v2845_v6  ;;  %v3056_v0 = vcombine.high %v3043_v55, %v3043_v55  ;;  %v893_v31 = vmul.f32 %v2882_v21, %v3043_v55 }
 0x107   : > { %3505 = vst [vmem:[#allocation19_spill] sm:$0xff] %v3046_v59  ;;  %v3060_v3 = vcombine.high %v3046_v59, %v3046_v59  ;;  %v897_v32 = vmul.f32 %v2898_v29, %v3046_v59 }
 0x108   : > { %3506 = vst [vmem:[#allocation20_spill] sm:$0xff] %v3049_v60  ;;  %3507 = vst [vmem:[#allocation21_spill] sm:$0xff] %v3052_v62  ;;  %v3068_v49 = vcombine.high %v3049_v60, %v3049_v60  ;;  %v3072_v58 = vcombine.high %v3052_v62, %v3052_v62  ;;  %v894_v14 = vmul.f32 %v2885_v22, %v3049_v60 }
 0x109   : > { %3508 = vst [vmem:[#allocation22_spill] sm:$0xff] %v3056_v0  ;;  %v898_v50 = vmul.f32 %v2901_v30, %v3052_v62  ;;  %v895_v40 = vmul.f32 %v2889_v24, %v3056_v0  ;;  %v899_v39 = vmul.f32 %v2906_v33, %v3060_v3  ;;  %v901_v28 = vadd.f32 %v893_v31, %v825_v23 }
 0x10a   : > { %v905_v2 = vadd.f32 %v897_v32, %v829_v26  ;;  %v896_v27 = vmul.f32 %v2892_v25, %v3068_v49  ;;  %v900_v61 = vmul.f32 %v2909_v34, %v3072_v58  ;;  %v902_v29 = vadd.f32 %v894_v14, %v826_v38 }
 0x10b   : > { %v906_v21 = vadd.f32 %v898_v50, %v830_v45  ;;  %v903_v22 = vadd.f32 %v895_v40, %v827_v43  ;;  %v907_v59 = vadd.f32 %v899_v39, %v831_v48  ;;  %v993_v60 = vadd.f32 %v991_v11, %v989_v4 }
 0x10c   : > { %v911_v30 = vcombine.low %v760_v35, %v762_v44  ;;  %v904_v62 = vadd.f32 %v896_v27, %v828_v51  ;;  %v908_v55 = vadd.f32 %v900_v61, %v832_v52  ;;  %v912_v24 = vcombine.high %v760_v35, %v762_v44 }
 0x10d   : > { %v992_v0 = vmul.f32 %v762_v44, %v762_v44  ;;  %v1003_v16 = vadd.f32 1e-06, %v993_v60 }
 0x10e   : > { %v919_v23 = vrot.slane %v911_v30, %v2845_v6  ;;  %v926_v26 = vrot.slane %v912_v24, %v2845_v6 }
 0x10f   : > { %v994_v31 = vadd.f32 %v992_v0, %v990_v5  ;;  %2752 = vrcp.f32 %v1003_v16 }
 0x110   : > { %v927_v32 = vcombine.high %v919_v23, %v919_v23  ;;  %v935_v33 = vrot.slane %v919_v23, %v2845_v6  ;;  %v928_v38 = vcombine.high %v926_v26, %v926_v26  ;;  %v942_v40 = vrot.slane %v926_v26, %v2845_v6 }
 0x111   : > { %v1004_v39 = vadd.f32 1e-06, %v994_v31 }
 0x112   : > { %v949_v4 = vrot.slane %v927_v32, %v2845_v6  ;;  %v957_v27 = vcombine.high %v935_v33, %v935_v33  ;;  %v969_v61 = vmul.f32 %v2919_v41, %v935_v33  ;;  %v956_v35 = vrot.slane %v928_v38, %v2845_v6 }
 0x113   : > { %v958_v43 = vcombine.high %v942_v40, %v942_v40  ;;  %v973_v30 = vmul.f32 %v2937_v53, %v942_v40  ;;  %2754 = vrcp.f32 %v1004_v39 }
 0x114   : > { %v3094_v0 = vcombine.high %v949_v4, %v949_v4  ;;  %v970_v24 = vmul.f32 %v2922_v42, %v949_v4  ;;  %v971_v16 = vmul.f32 %v2927_v46, %v957_v27  ;;  %v977_v44 = vadd.f32 %v969_v61, %v901_v28 }
 0x115   : > { %v3098_v45 = vcombine.high %v956_v35, %v956_v35  ;;  %v974_v48 = vmul.f32 %v2940_v54, %v956_v35  ;;  %v975_v51 = vmul.f32 %v2944_v56, %v958_v43  ;;  %v981_v52 = vadd.f32 %v973_v30, %v905_v2 }
 0x116   : > { %v972_v60 = vmul.f32 %v2930_v47, %v3094_v0  ;;  %v978_v5 = vadd.f32 %v970_v24, %v902_v29  ;;  %v979_v11 = vadd.f32 %v971_v16, %v903_v22  ;;  %v995_v30 = vmin.f32 %v977_v44, 0.0 }
 0x117   : > { %v976_v14 = vmul.f32 %v2947_v57, %v3098_v45  ;;  %v982_v50 = vadd.f32 %v974_v48, %v906_v21  ;;  %v983_v23 = vadd.f32 %v975_v51, %v907_v59  ;;  %v999_v56 = vmin.f32 %v981_v52, 0.0 }
 0x118   : > { %v980_v26 = vadd.f32 %v972_v60, %v904_v62  ;;  %v996_v21 = vmin.f32 %v978_v5, 0.0  ;;  %v997_v59 = vmin.f32 %v979_v11, 0.0 }
 0x119   : > { %v984_v31 = vadd.f32 %v976_v14, %v908_v55  ;;  %v2753_v28 = vpop.eup %2752  ;;  %v1000_v62 = vmin.f32 %v982_v50, 0.0  ;;  %v1001_v55 = vmin.f32 %v983_v23, 0.0 }
 0x11a   : > { %v998_v14 = vmin.f32 %v980_v26, 0.0 }
 0x11d   : > { %v2755_v32 = vpop.eup %2754 }
 0x11e   : > { %v1009_v38 = vcombine.low %v2753_v28, %v2755_v32  ;;  %v1010_v39 = vcombine.high %v2753_v28, %v2755_v32  ;;  %v1002_v28 = vmin.f32 %v984_v31, 0.0 }
 0x120   : > { %v1017_v61 = vrot.slane %v1009_v38, %v2845_v6  ;;  %v1024_v2 = vrot.slane %v1010_v39, %v2845_v6 }
 0x122   : > { %v1025_v54 = vcombine.high %v1017_v61, %v1017_v61  ;;  %v1026_v29 = vcombine.high %v1024_v2, %v1024_v2  ;;  %v1033_v22 = vrot.slane %v1017_v61, %v2845_v6  ;;  %v1040_v24 = vrot.slane %v1024_v2, %v2845_v6 }
 0x124   : > { %v1047_v16 = vrot.slane %v1025_v54, %v2845_v6  ;;  %v1054_v48 = vrot.slane %v1026_v29, %v2845_v6  ;;  %v1055_v51 = vcombine.high %v1033_v22, %v1033_v22  ;;  %v1056_v60 = vcombine.high %v1040_v24, %v1040_v24 }
 0x125   : > { %v1067_v44 = vmul.f32 %v1033_v22, %v995_v30  ;;  %v1071_v52 = vmul.f32 %v1040_v24, %v999_v56 }
 0x126   : > { %v1068_v32 = vmul.f32 %v1047_v16, %v996_v21  ;;  %v1069_v38 = vmul.f32 %v1055_v51, %v997_v59  ;;  %v1072_v39 = vmul.f32 %v1054_v48, %v1000_v62  ;;  %v1073_v61 = vmul.f32 %v1056_v60, %v1001_v55  ;;  %v3509_v21 = vld [vmem:[#allocation2_spill] sm:$0xff]  ;;  %v3511_v55 = vld [vmem:[#allocation20_spill] sm:$0xff]  ;;  %v3513_v51 = vld [vmem:[#allocation19_spill] sm:$0xff] }
 0x127   : > { %v3112_v57 = vmul.f32 %v1067_v44, %v935_v33  ;;  %v3114_v5 = vmul.f32 %v1071_v52, %v942_v40  ;;  %v1057_v11 = vcombine.high %v1047_v16, %v1047_v16  ;;  %v1058_v50 = vcombine.high %v1054_v48, %v1054_v48  ;;  %v3512_v16 = vld [vmem:[#allocation22_spill] sm:$0xff]  ;;  %v3514_v60 = vld [vmem:[#allocation21_spill] sm:$0xff] }
 0x128   : > { %v3116_v23 = vmul.f32 %v1068_v32, %v949_v4  ;;  %v3118_v54 = vmul.f32 %v1069_v38, %v957_v27  ;;  %v3120_v2 = vmul.f32 %v1072_v39, %v956_v35  ;;  %v3122_v26 = vmul.f32 %v1073_v61, %v958_v43 }
 0x129   : > { %v1070_v31 = vmul.f32 %v1057_v11, %v998_v14  ;;  %v1074_v56 = vmul.f32 %v1058_v50, %v1002_v28  ;;  %v1075_v30 = vmul.f32 %v1067_v44, %v2997_v63  ;;  %v1076_v29 = vmul.f32 %v1068_v32, %v3003_v17  ;;  %v3515_v11 = vld [vmem:[#allocation3_spill] sm:$0xff]  ;;  %v3516_v50 = vld [vmem:[#allocation4_spill] sm:$0xff] }
 0x12a   : > { %v1077_v33 = vmul.f32 %v1069_v38, %v3010_v19  ;;  %v1079_v40 = vmul.f32 %v1071_v52, %v3000_v1  ;;  %v1080_v22 = vmul.f32 %v1072_v39, %v3006_v18  ;;  %v1081_v4 = vmul.f32 %v1073_v61, %v3014_v20 }
 0x12b   : > { %v1078_v27 = vmul.f32 %v1070_v31, %v3024_v36  ;;  %v1082_v35 = vmul.f32 %v1074_v56, %v3028_v37  ;;  %v1083_v43 = vsub.f32 %v2848_v7, %v1075_v30  ;;  %v1084_v24 = vsub.f32 %v2851_v8, %v1076_v29  ;;  %v3510_v36 = vld [vmem:[#allocation18_spill] sm:$0xff]  ;;  %v3517_v29 = vld [vmem:[#allocation5_spill] sm:$0xff] }
 0x12c   : > { %v1085_v63 = vsub.f32 %v2854_v9, %v1077_v33  ;;  %v1087_v17 = vsub.f32 %v2862_v12, %v1079_v40  ;;  %v1088_v19 = vsub.f32 %v2865_v13, %v1080_v22  ;;  %v1089_v1 = vsub.f32 %v2870_v15, %v1081_v4  ;;  %v3518_v40 = vld [vmem:[#allocation6_spill] sm:$0xff]  ;;  %v3519_v4 = vld [vmem:[#allocation7_spill] sm:$0xff] }
 0x12d   : > { %v1086_v18 = vsub.f32 %v2857_v10, %v1078_v27  ;;  %v1090_v20 = vsub.f32 %v3509_v21, %v1082_v35  ;;  %v1132_v59 = vcombine.low %v1083_v43, %v1084_v24  ;;  %v1091_v62 = vmul.f32 %v1067_v44, %v3510_v36 }
 0x12e   : > { %v1134_v37 = vcombine.low %v1087_v17, %v1088_v19  ;;  %v1092_v7 = vmul.f32 %v1068_v32, %v3511_v55  ;;  %v1093_v8 = vmul.f32 %v1069_v38, %v3512_v16  ;;  %v1094_v9 = vmul.f32 %v1070_v31, %v3068_v49 }
 0x12f   : > { %v1133_v48 = vcombine.low %v1085_v63, %v1086_v18  ;;  %v1135_v12 = vcombine.low %v1089_v1, %v1090_v20  ;;  %v1142_v13 = vrot.slane %v1132_v59, %v2845_v6  ;;  %v1095_v15 = vmul.f32 %v1071_v52, %v3513_v51  ;;  %v1123_v51 = vld [vmem:[%s3460_s2] sm:$0xff] }
 0x130   : > { %v1156_v10 = vrot.slane %v1134_v37, %v2845_v6  ;;  %v1096_v14 = vmul.f32 %v1072_v39, %v3514_v60  ;;  %v1097_v28 = vmul.f32 %v1073_v61, %v3060_v3  ;;  %v1098_v44 = vmul.f32 %v1074_v56, %v3072_v58  ;;  %v3520_v61 = vld [vmem:[#allocation8_spill] sm:$0xff]  ;;  %v3521_v60 = vld [vmem:[#allocation9_spill] sm:$0xff] }
 0x131   : > { %v1149_v32 = vrot.slane %v1133_v48, %v2845_v6  ;;  %v1163_v38 = vrot.slane %v1135_v12, %v2845_v6  ;;  %v1099_v49 = vsub.f32 %v3515_v11, %v1091_v62  ;;  %v1100_v30 = vsub.f32 %v3516_v50, %v1092_v7 }
 0x132   : > { %v1101_v33 = vsub.f32 %v3517_v29, %v1093_v8  ;;  %v1102_v52 = vsub.f32 %v2892_v25, %v1094_v9  ;;  %v1103_v22 = vsub.f32 %v3518_v40, %v1095_v15  ;;  %v1104_v39 = vsub.f32 %v3519_v4, %v1096_v14 }
 0x133   : > { %v1165_v27 = vcombine.high %v1142_v13, %v1149_v32  ;;  %v1167_v3 = vcombine.high %v1156_v10, %v1163_v38  ;;  %v1105_v58 = vsub.f32 %v3520_v61, %v1097_v28  ;;  %v1106_v35 = vsub.f32 %v2909_v34, %v1098_v44  ;;  %v3523_v28 = vld [vmem:[#allocation11_spill] sm:$0xff] }
 0x134   : > { %v1282_v43 = vcombine.low %v1099_v49, %v1100_v30  ;;  %v1283_v24 = vcombine.low %v1101_v33, %v1102_v52  ;;  %v1284_v63 = vcombine.low %v1103_v22, %v1104_v39  ;;  %v1164_v17 = vcombine.low %v1142_v13, %v1149_v32 }
 0x135   : > { %v1181_v19 = vrot.slane %v1165_v27, %v2845_v6  ;;  %v1195_v1 = vrot.slane %v1167_v3, %v2845_v6  ;;  %v1285_v18 = vcombine.low %v1105_v58, %v1106_v35  ;;  %v1166_v25 = vcombine.low %v1156_v10, %v1163_v38  ;;  %v1568_v58 = vld [vmem:[%s3461_s3] sm:$0xff] }
 0x136   : > { %v1292_v21 = vrot.slane %v1282_v43, %v2845_v6  ;;  %v1299_v20 = vrot.slane %v1283_v24, %v2845_v6  ;;  %v1306_v59 = vrot.slane %v1284_v63, %v2845_v6  ;;  %v1174_v36 = vrot.slane %v1164_v17, %v2845_v6 }
 0x137   : > { %v1197_v62 = vcombine.low %v1181_v19, %v1195_v1  ;;  %v1313_v34 = vrot.slane %v1285_v18, %v2845_v6  ;;  %v1188_v37 = vrot.slane %v1166_v25, %v2845_v6  ;;  %v1110_v55 = vmul.f32 %v1070_v31, %v3094_v0 }
 0x138   : > { %v1315_v7 = vcombine.high %v1292_v21, %v1299_v20  ;;  %v1314_v16 = vcombine.low %v1292_v21, %v1299_v20  ;;  %v1114_v8 = vmul.f32 %v1074_v56, %v3098_v45  ;;  %v1115_v9 = vsub.f32 %v2919_v41, %v3112_v57 }
 0x139   : > { %1203 = vmatprep.subr.mxu1 %v1197_v62  ;;  %v1317_v48 = vcombine.high %v1306_v59, %v1313_v34  ;;  %v1196_v12 = vcombine.low %v1174_v36, %v1188_v37  ;;  %v1316_v13 = vcombine.low %v1306_v59, %v1313_v34  ;;  %v1116_v15 = vsub.f32 %v2922_v42, %v3116_v23  ;;  %v3522_v23 = vld [vmem:[#allocation10_spill] sm:$0xff] }
 0x13a   : > { %v1331_v0 = vrot.slane %v1315_v7, %v2845_v6  ;;  %v1324_v31 = vrot.slane %v1314_v16, %v2845_v6  ;;  %v1117_v45 = vsub.f32 %v2927_v46, %v3118_v54  ;;  %v1118_v41 = vsub.f32 %v2930_v47, %v1110_v55 }
 0x13b   : > { %v1345_v57 = vrot.slane %v1317_v48, %v2845_v6  ;;  %1204 = vmatpush1.msra.mxu1 %v1196_v12  ;;  %v1338_v56 = vrot.slane %v1316_v13, %v2845_v6  ;;  %v1119_v10 = vsub.f32 %v2937_v53, %v3114_v5  ;;  %v1120_v42 = vsub.f32 %v3521_v60, %v3120_v2 }
 0x13c   : > { %2651 = vmatmul.mubr.msk.f32.vlgmr.msra.gmra.mrb[2].mxu1 %vm396_vm0, %v1123_v51  ;;  %v1121_v14 = vsub.f32 %v3522_v23, %v3122_v26  ;;  %v1122_v46 = vsub.f32 %v3523_v28, %v1114_v8  ;;  %v1429_v54 = vcombine.low %v1115_v9, %v1116_v15  ;;  %v1430_v47 = vcombine.low %v1117_v45, %v1118_v41 }
 0x13d   : > { %v1347_v44 = vcombine.low %v1331_v0, %v1345_v57  ;;  %v1346_v32 = vcombine.low %v1324_v31, %v1338_v56  ;;  %v1431_v38 = vcombine.low %v1119_v10, %v1120_v42  ;;  %v3524_v11 = vmov 0.0  }
 0x13e   : > { %1561 = vmatprep.mubr.f32.mxu1 %v3524_v11  ;;  %v1432_v49 = vcombine.low %v1121_v14, %v1122_v46  ;;  %v1439_v53 = vrot.slane %v1429_v54, %v2845_v6  ;;  %v1446_v5 = vrot.slane %v1430_v47, %v2845_v6 }
 0x13f   : > { %1350 = vmatprep.subr.mxu0 %v1347_v44  ;;  %v1453_v2 = vrot.slane %v1431_v38, %v2845_v6 }
 0x140   : > { %1351 = vmatpush1.msra.mxu0 %v1346_v32  ;;  %v1460_v26 = vrot.slane %v1432_v49, %v2845_v6  ;;  %v1462_v50 = vcombine.high %v1439_v53, %v1446_v5  ;;  %v1461_v30 = vcombine.low %v1439_v53, %v1446_v5 }
 0x141   : > { %2652 = vmatmul.mubr.msk.f32.vlgmr.msra.gmra.mrb[4].mxu0 %vm396_vm0, %v1123_v51 }
 0x142   : > { %v1464_v29 = vcombine.high %v1453_v2, %v1460_v26  ;;  %v1478_v33 = vrot.slane %v1462_v50, %v2845_v6  ;;  %v1463_v52 = vcombine.low %v1453_v2, %v1460_v26  ;;  %v1471_v40 = vrot.slane %v1461_v30, %v2845_v6  ;;  %1636 = vmatprep.mubr.f32.mxu0 %v3524_v11  ;;  %v3525_v30 = vld [vmem:[#allocation12_spill] sm:$0xff] }
 0x144   : > { %v1492_v22 = vrot.slane %v1464_v29, %v2845_v6  ;;  %v1485_v4 = vrot.slane %v1463_v52, %v2845_v6 }
 0x146   : > { %v1494_v39 = vcombine.low %v1478_v33, %v1492_v22  ;;  %v1493_v27 = vcombine.low %v1471_v40, %v1485_v4  ;;  %v3526_v33 = vld [vmem:[#allocation14_spill] sm:$0xff]  ;;  %v3527_v40 = vld [vmem:[#allocation13_spill] sm:$0xff]  ;;  %v3528_v4 = vld [vmem:[#allocation15_spill] sm:$0xff] }
 0x148   : > { %1497 = vmatprep.subr.mxu1 %v1494_v39 }
 0x149   : > { %1498 = vmatpush1.msra.mxu1 %v1493_v27  ;;  %v3529_v27 = vld [vmem:[#allocation16_spill] sm:$0xff] }
 0x14a   : > { %2653 = vmatmul.mubr.msk.f32.vlgmr.msra.gmra.mrb[4].mxu1 %vm396_vm0, %v1123_v51 }
 0x14b   : > { %1707 = vmatprep.mubr.f32.mxu1 %v3524_v11 }
 0x20f   : > { %v3205_v3 = vpop.f32.mrb[2].mxu1 }
 0x210   : > { %v3207_v61 = vpop.f32.mrb[3].mxu1 }
 0x211   : > { %1572 = vmatprep.subr.mxu0 %v3207_v61 }
 0x212   : > { %1573 = vmatpush1.msra.mxu0 %v3205_v3 }
 0x213   : > { %2654 = vmatmul.mubr.msk.f32.vlgmr.msra.gmra.mrb[6].mxu0 %vm396_vm0, %v1568_v58 }
 0x214   : > { %v3215_v35 = vpop.f32.mrb[4].mxu0  ;;  %1778 = vmatprep.mubr.f32.mxu0 %v3524_v11 }
 0x215   : > { %v1418_v43 = vpop.f32.mrb[5].mxu0 }
 0x216   : > { %1643 = vmatprep.subr.mxu1 %v1418_v43 }
 0x217   : > { %1644 = vmatpush1.msra.mxu1 %v3215_v35 }
 0x218   : > { %2655 = vmatmul.mubr.msk.f32.vlgmr.msra.gmra.mrb[6].mxu1 %vm396_vm0, %v1568_v58 }
 0x219   : > { %1898 = vmatprep.mubr.f32.mxu1 %v3524_v11 }
 0x21d   : > { %v3221_v24 = vpop.f32.mrb[4].mxu1 }
 0x21e   : > { %v1565_v63 = vpop.f32.mrb[5].mxu1 }
 0x21f   : > { %1714 = vmatprep.subr.mxu0 %v1565_v63 }
 0x220   : > { %1715 = vmatpush1.msra.mxu0 %v3221_v24 }
 0x221   : > { %2656 = vmatmul.mubr.msk.f32.vlgmr.msra.gmra.mrb[8].mxu0 %vm396_vm0, %v1568_v58 }
 0x222   : > { %1975 = vmatprep.mubr.f32.mxu0 %v3524_v11 }
 0x2e6   : > { %v1638_v17 = vpop.f32.mrb[6].mxu0 }
 0x2e7   : > { %v1785_v19 = vmul.f32 %v1638_v17, %v3205_v3  ;;  %v1640_v1 = vpop.f32.mrb[7].mxu0  ;;  %v1795_v25 = vmul.f32 %v1638_v17, %v1638_v17 }
 0x2e8   : > { %v1786_v18 = vmul.f32 %v1640_v1, %v3207_v61  ;;  %v1796_v20 = vmul.f32 %v1640_v1, %v1640_v1 }
 0x2eb   : > { %v1709_v21 = vpop.f32.mrb[6].mxu1 }
 0x2ec   : > { %v1787_v59 = vmul.f32 %v1709_v21, %v3215_v35  ;;  %v1797_v36 = vmul.f32 %v1709_v21, %v1709_v21  ;;  %v1711_v62 = vpop.f32.mrb[7].mxu1 }
 0x2ed   : > { %v1788_v34 = vmul.f32 %v1711_v62, %v1418_v43  ;;  %v1798_v37 = vmul.f32 %v1711_v62, %v1711_v62 }
 0x2ee   : > { %v1789_v55 = vadd.f32 %v1787_v59, %v1785_v19  ;;  %v1799_v7 = vadd.f32 %v1797_v36, %v1795_v25 }
 0x2ef   : > { %v1790_v16 = vadd.f32 %v1788_v34, %v1786_v18  ;;  %v1800_v8 = vadd.f32 %v1798_v37, %v1796_v20  ;;  %v3531_v37 = vlaneseq }
 0x2f1   : > { %vm3263_vm2 = vcmp.lt.s32.totalorder %v3531_v37, 256 }
 0x2f4   : > { %v1780_v9 = vpop.f32.mrb[8].mxu0 }
 0x2f5   : > { %v1791_v48 = vmul.f32 %v1780_v9, %v3221_v24  ;;  %v1801_v12 = vmul.f32 %v1780_v9, %v1780_v9  ;;  %v1782_v13 = vpop.f32.mrb[9].mxu0 }
 0x2f6   : > { %v1792_v51 = vmul.f32 %v1782_v13, %v1565_v63  ;;  %v1802_v15 = vmul.f32 %v1782_v13, %v1782_v13 }
 0x2f7   : > { %v1793_v0 = vadd.f32 %v1791_v48, %v1789_v55  ;;  %v1803_v31 = vadd.f32 %v1801_v12, %v1799_v7 }
 0x2f8   : > { %v1794_v45 = vadd.f32 %v1792_v51, %v1790_v16  ;;  %v1804_v41 = vadd.f32 %v1802_v15, %v1800_v8 }
 0x2f9   : > { %v1807_v57 = vadd.f32 1e-06, %v1803_v31  ;;  %v1805_v10 = vmin.f32 %v1793_v0, 0.0 }
 0x2fa   : > { %v1808_v56 = vadd.f32 1e-06, %v1804_v41  ;;  %v1806_v42 = vmin.f32 %v1794_v45, 0.0 }
 0x2fb   : > { %2756 = vrcp.f32 %v1807_v57 }
 0x2fc   : > { %2758 = vrcp.f32 %v1808_v56 }
 0x305   : > { %v2757_v60 = vpop.eup %2756 }
 0x306   : > { %v2759_v23 = vpop.eup %2758  ;;  %v1811_v14 = vmul.f32 %v2757_v60, %v1805_v10 }
 0x307   : > { %v1812_v28 = vmul.f32 %v2759_v23, %v1806_v42 }
 0x308   : > { %v1821_v46 = vmul.f32 %v1811_v14, %v1780_v9  ;;  %v1813_v54 = vmul.f32 %v1811_v14, %v1638_v17  ;;  %v1817_v47 = vmul.f32 %v1811_v14, %v1709_v21 }
 0x309   : > { %v1822_v44 = vmul.f32 %v1812_v28, %v1782_v13  ;;  %v1814_v32 = vmul.f32 %v1812_v28, %v1640_v1  ;;  %v1818_v38 = vmul.f32 %v1812_v28, %v1711_v62 }
 0x30a   : > { %v1823_v49 = vsub.f32 %v3221_v24, %v1821_v46  ;;  %v1815_v53 = vsub.f32 %v3205_v3, %v1813_v54  ;;  %v1819_v5 = vsub.f32 %v3215_v35, %v1817_v47  ;;  %v1825_v3 = vld [vmem:[%s3462_s4] sm:$0xff] }
 0x30b   : > { %v1824_v2 = vsub.f32 %v1565_v63, %v1822_v44  ;;  %v1816_v26 = vsub.f32 %v3207_v61, %v1814_v32  ;;  %v1820_v50 = vsub.f32 %v1418_v43, %v1818_v38  ;;  %v3530_v61 = vld [vmem:[#allocation17_spill] sm:$0xff]  ;;  %v1826_v43 = vld [vmem:[%s3462_s4 + $0x8] sm:$0xff] }
 0x30c   : > { %v2716_v22 = vpack.c.bf16 %v3527_v40, %v1815_v53  ;;  %v2720_v39 = vpack.c.bf16 %v3528_v4, %v1819_v5  ;;  %v2724_v35 = vpack.c.bf16 %v3530_v61, %v1823_v49 }
 0x30d   : > { %v2714_v29 = vpack.c.bf16 %v3525_v30, %v1816_v26  ;;  %v2718_v52 = vpack.c.bf16 %v3526_v33, %v1820_v50  ;;  %v2722_v58 = vpack.c.bf16 %v3529_v27, %v1824_v2 }
 0x30f   : > { %2715 = vmatprep.subr.bf16.mxu1 %v2714_v29  ;;  %2719 = vmatprep.subr.bf16.mxu0 %v2718_v52 }
 0x310   : > { %2717 = vmatpush1.bf16.msra.mxu1 %v2716_v22  ;;  %2721 = vmatpush1.bf16.msra.mxu0 %v2720_v39 }
 0x311   : > { %2723 = vmatprep.subr.bf16.mxu1 %v2722_v58 }
 0x313   : > { %2657 = vmatmul.mubr.msk.f32.vlgmr.msra.gmra.mrb[8].mxu1 %vm1827_vm1, %v1825_v3  ;;  %2659 = vmatmul.mubr.msk.f32.vlgmr.msra.gmra.mrb[10].mxu0 %vm1827_vm1, %v1825_v3 }
 0x314   : > { %2725 = vmatpush1.bf16.msra.mxu1 %v2724_v35  ;;  %1904 = vmatprep.mubr.f32.mxu1 %v3524_v11 }
 0x315   : > { %1981 = vmatprep.mubr.f32.mxu0 %v3524_v11 }
 0x317   : > { %2658 = vmatmul.mubr.msk.f32.gmra.mrb[10].mxu1 %vm1827_vm1, %v1826_v43  ;;  %2660 = vmatmul.mubr.msk.f32.gmra.mrb[12].mxu0 %vm1827_vm1, %v1826_v43 }
 0x318   : > { %2052 = vmatprep.mubr.f32.mxu1 %v3524_v11 }
 0x31b   : > { %2661 = vmatmul.mubr.msk.f32.vlgmr.msra.gmra.mrb[12].mxu1 %vm1827_vm1, %v1825_v3 }
 0x31c   : > { %2058 = vmatprep.mubr.f32.mxu1 %v3524_v11 }
 0x31f   : > { %2662 = vmatmul.mubr.msk.f32.gmra.mrb[14].mxu1 %vm1827_vm1, %v1826_v43 }
 0x3e6   : > { %v1900_v24 = vpop.f32.mrb[8].mxu1  ;;  %v1977_v63 = vpop.f32.mrb[10].mxu0 }
 0x3e7   : > { %v1902_v17 = vpop.f32.mrb[9].mxu1  ;;  %v1979_v19 = vpop.f32.mrb[11].mxu0 }
 0x3e8   : > { %v2069_v1 = vcombine.low %v1900_v24, %v1902_v17  ;;  %v2070_v18 = vcombine.high %v1900_v24, %v1902_v17  ;;  %v2224_v25 = vcombine.low %v1977_v63, %v1979_v19  ;;  %v2225_v21 = vcombine.high %v1977_v63, %v1979_v19 }
 0x3ea   : > { %v2077_v20 = vrot.slane %v2069_v1, %v2845_v6  ;;  %v2084_v59 = vrot.slane %v2070_v18, %v2845_v6  ;;  %v1906_v36 = vpop.f32.mrb[10].mxu1  ;;  %v2232_v11 = vrot.slane %v2224_v25, %v2845_v6  ;;  %v2239_v62 = vrot.slane %v2225_v21, %v2845_v6  ;;  %v3255_v34 = vpop.f32.mrb[12].mxu0 }
 0x3eb   : > { %v1908_v7 = vpop.f32.mrb[11].mxu1  ;;  %v3267_v16 = vpop.f32.mrb[13].mxu0 }
 0x3ec   : > { %v2085_v8 = vcombine.high %v2077_v20, %v2077_v20  ;;  %v2086_v9 = vcombine.high %v2084_v59, %v2084_v59  ;;  %v2093_v48 = vrot.slane %v2077_v20, %v2845_v6  ;;  %v2100_v12 = vrot.slane %v2084_v59, %v2845_v6 }
 0x3ed   : > { %v2119_v13 = vcombine.low %v1906_v36, %v1908_v7  ;;  %v2120_v51 = vcombine.high %v1906_v36, %v1908_v7  ;;  %v2240_v15 = vcombine.high %v2232_v11, %v2232_v11  ;;  %v2241_v0 = vcombine.high %v2239_v62, %v2239_v62 }
 0x3ee   : > { %v2107_v31 = vrot.slane %v2085_v8, %v2845_v6  ;;  %v2114_v45 = vrot.slane %v2086_v9, %v2845_v6  ;;  %v2115_v41 = vcombine.high %v2093_v48, %v2093_v48  ;;  %v2116_v57 = vcombine.high %v2100_v12, %v2100_v12  ;;  %2189 = vst.msk [vmem:[%s3260_s16] ss:$4 sm:$0x3] %vm3263_vm2, %v2093_v48  ;;  %v2054_v56 = vpop.f32.mrb[12].mxu1 }
 0x3ef   : > { %2666 = vst.msk [vmem:[%s3260_s16 + $0x20] ss:$4 sm:$0x3] %vm3263_vm2, %v2100_v12  ;;  %v2127_v10 = vrot.slane %v2119_v13, %v2845_v6  ;;  %v2134_v60 = vrot.slane %v2120_v51, %v2845_v6  ;;  %v2248_v42 = vrot.slane %v2232_v11, %v2845_v6  ;;  %v2255_v23 = vrot.slane %v2239_v62, %v2845_v6  ;;  %v2056_v14 = vpop.f32.mrb[13].mxu1 }
 0x3f0   : > { %v2117_v28 = vcombine.high %v2107_v31, %v2107_v31  ;;  %v2118_v46 = vcombine.high %v2114_v45, %v2114_v45  ;;  %2663 = vst.msk [vmem:[%s3260_s16 + $0x8] ss:$4 sm:$0x3] %vm3263_vm2, %v2107_v31  ;;  %2664 = vst.msk [vmem:[%s3260_s16 + $0x10] ss:$4 sm:$0x3] %vm3263_vm2, %v2115_v41  ;;  %v2262_v54 = vrot.slane %v2240_v15, %v2845_v6 }
 0x3f1   : > { %2667 = vst.msk [vmem:[%s3260_s16 + $0x28] ss:$4 sm:$0x3] %vm3263_vm2, %v2114_v45  ;;  %2668 = vst.msk [vmem:[%s3260_s16 + $0x30] ss:$4 sm:$0x3] %vm3263_vm2, %v2116_v57  ;;  %v2269_v47 = vrot.slane %v2241_v0, %v2845_v6  ;;  %v2135_v44 = vcombine.high %v2127_v10, %v2127_v10  ;;  %v2136_v32 = vcombine.high %v2134_v60, %v2134_v60 }
 0x3f2   : > { %v2143_v38 = vrot.slane %v2127_v10, %v2845_v6  ;;  %v2150_v49 = vrot.slane %v2134_v60, %v2845_v6  ;;  %2678 = vst.msk [vmem:[%s3260_s16 + $0x1] ss:$4 sm:$0x3] %vm3263_vm2, %v2248_v42  ;;  %2682 = vst.msk [vmem:[%s3260_s16 + $0x21] ss:$4 sm:$0x3] %vm3263_vm2, %v2255_v23  ;;  %v2270_v53 = vcombine.high %v2248_v42, %v2248_v42 }
 0x3f3   : > { %2665 = vst.msk [vmem:[%s3260_s16 + $0x18] ss:$4 sm:$0x3] %vm3263_vm2, %v2117_v28  ;;  %2669 = vst.msk [vmem:[%s3260_s16 + $0x38] ss:$4 sm:$0x3] %vm3263_vm2, %v2118_v46  ;;  %v2271_v5 = vcombine.high %v2255_v23, %v2255_v23  ;;  %v2272_v2 = vcombine.high %v2262_v54, %v2262_v54  ;;  %v2273_v26 = vcombine.high %v2269_v47, %v2269_v47 }
 0x3f4   : > { %2679 = vst.msk [vmem:[%s3260_s16 + $0x9] ss:$4 sm:$0x3] %vm3263_vm2, %v2262_v54  ;;  %2683 = vst.msk [vmem:[%s3260_s16 + $0x29] ss:$4 sm:$0x3] %vm3263_vm2, %v2269_v47  ;;  %v2157_v30 = vrot.slane %v2135_v44, %v2845_v6  ;;  %v2164_v29 = vrot.slane %v2136_v32, %v2845_v6  ;;  %v2165_v33 = vcombine.high %v2143_v38, %v2143_v38 }
 0x3f5   : > { %v2060_v50 = vpop.f32.mrb[14].mxu1  ;;  %v2166_v52 = vcombine.high %v2150_v49, %v2150_v49  ;;  %2670 = vst.msk [vmem:[%s3260_s16 + $0x40] ss:$4 sm:$0x3] %vm3263_vm2, %v2143_v38  ;;  %v2376_v22 = vcombine.low %v2054_v56, %v2056_v14  ;;  %v2377_v4 = vcombine.high %v2054_v56, %v2056_v14  ;;  %v2274_v39 = vcombine.low %v3255_v34, %v3267_v16 }
 0x3f6   : > { %2674 = vst.msk [vmem:[%s3260_s16 + $0x60] ss:$4 sm:$0x3] %vm3263_vm2, %v2150_v49  ;;  %v2062_v40 = vpop.f32.mrb[15].mxu1  ;;  %v2275_v27 = vcombine.high %v3255_v34, %v3267_v16  ;;  %v2167_v58 = vcombine.high %v2157_v30, %v2157_v30  ;;  %v2168_v3 = vcombine.high %v2164_v29, %v2164_v29 }
 0x3f7   : > { %2680 = vst.msk [vmem:[%s3260_s16 + $0x11] ss:$4 sm:$0x3] %vm3263_vm2, %v2270_v53  ;;  %2681 = vst.msk [vmem:[%s3260_s16 + $0x19] ss:$4 sm:$0x3] %vm3263_vm2, %v2272_v2  ;;  %v2426_v61 = vcombine.low %v2060_v50, %v2062_v40  ;;  %v2427_v35 = vcombine.high %v2060_v50, %v2062_v40  ;;  %v2384_v43 = vrot.slane %v2376_v22, %v2845_v6 }
 0x3f8   : > { %2684 = vst.msk [vmem:[%s3260_s16 + $0x31] ss:$4 sm:$0x3] %vm3263_vm2, %v2271_v5  ;;  %2685 = vst.msk [vmem:[%s3260_s16 + $0x39] ss:$4 sm:$0x3] %vm3263_vm2, %v2273_v26  ;;  %v2391_v24 = vrot.slane %v2377_v4, %v2845_v6  ;;  %v2282_v63 = vrot.slane %v2274_v39, %v2845_v6  ;;  %v2289_v17 = vrot.slane %v2275_v27, %v2845_v6 }
 0x3f9   : > { %2671 = vst.msk [vmem:[%s3260_s16 + $0x48] ss:$4 sm:$0x3] %vm3263_vm2, %v2157_v30  ;;  %2672 = vst.msk [vmem:[%s3260_s16 + $0x50] ss:$4 sm:$0x3] %vm3263_vm2, %v2165_v33  ;;  %v2434_v19 = vrot.slane %v2426_v61, %v2845_v6  ;;  %v2441_v1 = vrot.slane %v2427_v35, %v2845_v6  ;;  %v2392_v18 = vcombine.high %v2384_v43, %v2384_v43 }
 0x3fa   : > { %2675 = vst.msk [vmem:[%s3260_s16 + $0x68] ss:$4 sm:$0x3] %vm3263_vm2, %v2164_v29  ;;  %2676 = vst.msk [vmem:[%s3260_s16 + $0x70] ss:$4 sm:$0x3] %vm3263_vm2, %v2166_v52  ;;  %v2393_v25 = vcombine.high %v2391_v24, %v2391_v24  ;;  %v2400_v21 = vrot.slane %v2384_v43, %v2845_v6  ;;  %v2407_v20 = vrot.slane %v2391_v24, %v2845_v6 }
 0x3fb   : > { %2673 = vst.msk [vmem:[%s3260_s16 + $0x58] ss:$4 sm:$0x3] %vm3263_vm2, %v2167_v58  ;;  %2677 = vst.msk [vmem:[%s3260_s16 + $0x78] ss:$4 sm:$0x3] %vm3263_vm2, %v2168_v3  ;;  %v2290_v59 = vcombine.high %v2282_v63, %v2282_v63  ;;  %v2291_v36 = vcombine.high %v2289_v17, %v2289_v17  ;;  %v2298_v11 = vrot.slane %v2282_v63, %v2845_v6 }
 0x3fc   : > { %v2305_v62 = vrot.slane %v2289_v17, %v2845_v6  ;;  %v2414_v34 = vrot.slane %v2392_v18, %v2845_v6  ;;  %v2421_v37 = vrot.slane %v2393_v25, %v2845_v6  ;;  %v2422_v7 = vcombine.high %v2400_v21, %v2400_v21  ;;  %2694 = vst.msk [vmem:[%s3260_s16 + $0x2] ss:$4 sm:$0x3] %vm3263_vm2, %v2400_v21 }
 0x3fd   : > { %v2423_v16 = vcombine.high %v2407_v20, %v2407_v20  ;;  %2698 = vst.msk [vmem:[%s3260_s16 + $0x22] ss:$4 sm:$0x3] %vm3263_vm2, %v2407_v20  ;;  %v2312_v8 = vrot.slane %v2290_v59, %v2845_v6  ;;  %v2319_v9 = vrot.slane %v2291_v36, %v2845_v6  ;;  %v2320_v48 = vcombine.high %v2298_v11, %v2298_v11 }
 0x3fe   : > { %v2321_v12 = vcombine.high %v2305_v62, %v2305_v62  ;;  %2686 = vst.msk [vmem:[%s3260_s16 + $0x41] ss:$4 sm:$0x3] %vm3263_vm2, %v2298_v11  ;;  %2690 = vst.msk [vmem:[%s3260_s16 + $0x61] ss:$4 sm:$0x3] %vm3263_vm2, %v2305_v62  ;;  %v2424_v13 = vcombine.high %v2414_v34, %v2414_v34  ;;  %v2425_v51 = vcombine.high %v2421_v37, %v2421_v37 }
 0x3ff   : > { %2695 = vst.msk [vmem:[%s3260_s16 + $0xa] ss:$4 sm:$0x3] %vm3263_vm2, %v2414_v34  ;;  %2696 = vst.msk [vmem:[%s3260_s16 + $0x12] ss:$4 sm:$0x3] %vm3263_vm2, %v2422_v7  ;;  %v2442_v15 = vcombine.high %v2434_v19, %v2434_v19  ;;  %v2443_v0 = vcombine.high %v2441_v1, %v2441_v1  ;;  %v2322_v31 = vcombine.high %v2312_v8, %v2312_v8 }
 0x400   : > { %2699 = vst.msk [vmem:[%s3260_s16 + $0x2a] ss:$4 sm:$0x3] %vm3263_vm2, %v2421_v37  ;;  %2700 = vst.msk [vmem:[%s3260_s16 + $0x32] ss:$4 sm:$0x3] %vm3263_vm2, %v2423_v16  ;;  %v2323_v45 = vcombine.high %v2319_v9, %v2319_v9  ;;  %v2450_v41 = vrot.slane %v2434_v19, %v2845_v6  ;;  %v2457_v57 = vrot.slane %v2441_v1, %v2845_v6 }
 0x401   : > { %2687 = vst.msk [vmem:[%s3260_s16 + $0x49] ss:$4 sm:$0x3] %vm3263_vm2, %v2312_v8  ;;  %2688 = vst.msk [vmem:[%s3260_s16 + $0x51] ss:$4 sm:$0x3] %vm3263_vm2, %v2320_v48  ;;  %v2464_v56 = vrot.slane %v2442_v15, %v2845_v6  ;;  %v2471_v10 = vrot.slane %v2443_v0, %v2845_v6 }
 0x402   : > { %2691 = vst.msk [vmem:[%s3260_s16 + $0x69] ss:$4 sm:$0x3] %vm3263_vm2, %v2319_v9  ;;  %2692 = vst.msk [vmem:[%s3260_s16 + $0x71] ss:$4 sm:$0x3] %vm3263_vm2, %v2321_v12  ;;  %v2472_v60 = vcombine.high %v2450_v41, %v2450_v41  ;;  %v2473_v42 = vcombine.high %v2457_v57, %v2457_v57 }
 0x403   : > { %2697 = vst.msk [vmem:[%s3260_s16 + $0x1a] ss:$4 sm:$0x3] %vm3263_vm2, %v2424_v13  ;;  %2701 = vst.msk [vmem:[%s3260_s16 + $0x3a] ss:$4 sm:$0x3] %vm3263_vm2, %v2425_v51  ;;  %v2474_v23 = vcombine.high %v2464_v56, %v2464_v56  ;;  %v2475_v14 = vcombine.high %v2471_v10, %v2471_v10 }
 0x404   : > { %2689 = vst.msk [vmem:[%s3260_s16 + $0x59] ss:$4 sm:$0x3] %vm3263_vm2, %v2322_v31  ;;  %2693 = vst.msk [vmem:[%s3260_s16 + $0x79] ss:$4 sm:$0x3] %vm3263_vm2, %v2323_v45 }
 0x405   : > { %2702 = vst.msk [vmem:[%s3260_s16 + $0x42] ss:$4 sm:$0x3] %vm3263_vm2, %v2450_v41  ;;  %2706 = vst.msk [vmem:[%s3260_s16 + $0x62] ss:$4 sm:$0x3] %vm3263_vm2, %v2457_v57 }
 0x406   : > { %2703 = vst.msk [vmem:[%s3260_s16 + $0x4a] ss:$4 sm:$0x3] %vm3263_vm2, %v2464_v56  ;;  %2707 = vst.msk [vmem:[%s3260_s16 + $0x6a] ss:$4 sm:$0x3] %vm3263_vm2, %v2471_v10 }
 0x407   : > { %2704 = vst.msk [vmem:[%s3260_s16 + $0x52] ss:$4 sm:$0x3] %vm3263_vm2, %v2472_v60  ;;  %2708 = vst.msk [vmem:[%s3260_s16 + $0x72] ss:$4 sm:$0x3] %vm3263_vm2, %v2473_v42 }
 0x408   : > { %2705 = vst.msk [vmem:[%s3260_s16 + $0x5a] ss:$4 sm:$0x3] %vm3263_vm2, %v2474_v23  ;;  %2709 = vst.msk [vmem:[%s3260_s16 + $0x7a] ss:$4 sm:$0x3] %vm3263_vm2, %v2475_v14 }
 0x409 PF: > { %s15_s20 = sadd.s32 1, %s2782_s20   ;;  %s3534_s18 = smov %s2778_s19 }
 0x40a   : > { %p12_p6 = scmp.ge.s32.totalorder %s15_s20, 4   ;;  %s3535_s19 = smov %s3537_s21 }
 0x40c   :  { %14 = sbr.rel (!%p12_p6) target bundleno = 2 (0x2), region = 140 }

</bundles_post_ra>
